<compile_context>
chip_gen: v7x
topology: tpu7x:2x2x1
jax: 0.10.0
libtpu: 0.0.40
codegen_flags: <defaults>
</compile_context>

<pallas_src>
import jax
import jax.numpy as jnp
from jax.experimental import pallas as pl
from jax.experimental.pallas import tpu as pltpu


def _round_up(x, m):
    return (x + m - 1) // m * m


def _bcq_kernel(s_ref, a_ref, w1s_ref, w1a_ref, b1_ref,
                w2_ref, b2_ref, w3_ref, b3_ref, o_ref):
    cd = w1s_ref.dtype                       # matmul (MXU) dtype
    state = s_ref[...]                       # [TB, Sp] f32
    action = a_ref[...]                      # [TB, Ap] f32

    # layer 1:  cat([state, action], 1) @ W1  ==  state @ W1s + action @ W1a
    h = jnp.dot(state.astype(cd), w1s_ref[...],
                preferred_element_type=jnp.float32)
    h = h + jnp.dot(action.astype(cd), w1a_ref[...],
                    preferred_element_type=jnp.float32)
    h = jnp.maximum(h + b1_ref[...], 0.0)
    # dropout(p=0.5): identity in eval mode.

    # layer 2
    h = jnp.dot(h.astype(cd), w2_ref[...], preferred_element_type=jnp.float32)
    h = jnp.maximum(h + b2_ref[...], 0.0)
    # dropout(p=0.5): identity in eval mode.

    # layer 3 + fused epilogue (bias + residual) -> one lane-dense store.
    out = jnp.dot(h.astype(cd), w3_ref[...], preferred_element_type=jnp.float32)
    o_ref[...] = (out + b3_ref[...] + action.astype(jnp.float32)).astype(o_ref.dtype)


def bcq_perturbator_forward(state, action, params, *,
                            compute_dtype=jnp.bfloat16, tile_b=512):
    """state: [B, num_inputs], action: [B, num_actions] -> [B, num_actions]."""
    B, num_inputs = state.shape
    num_actions = action.shape[1]
    hidden = params["w1"].shape[1]
    out_dtype = jnp.promote_types(state.dtype, action.dtype)

    # Lane-dense padded feature dims.
    Sp = _round_up(num_inputs, 128)
    Ap = _round_up(num_actions, 128)
    Hp = _round_up(hidden, 128)

    # Batch tiling (sublane-aligned); pad B up to a multiple of TILE_B.
    TB = min(tile_b, _round_up(B, 8))
    Bp = _round_up(B, TB)

    f32 = jnp.float32
    w1 = params["w1"]  # [num_inputs + num_actions, hidden], stored [in, out]

    # Split + zero-pad weights (concat elimination + lane-dense layout).
    w1s = jnp.zeros((Sp, Hp), compute_dtype).at[:num_inputs, :hidden].set(
        w1[:num_inputs].astype(compute_dtype))
    w1a = jnp.zeros((Ap, Hp), compute_dtype).at[:num_actions, :hidden].set(
        w1[num_inputs:].astype(compute_dtype))
    b1p = jnp.zeros((1, Hp), f32).at[:, :hidden].set(params["b1"].astype(f32))
    w2p = jnp.zeros((Hp, Hp), compute_dtype).at[:hidden, :hidden].set(
        params["w2"].astype(compute_dtype))
    b2p = jnp.zeros((1, Hp), f32).at[:, :hidden].set(params["b2"].astype(f32))
    w3p = jnp.zeros((Hp, Ap), compute_dtype).at[:hidden, :num_actions].set(
        params["w3"].astype(compute_dtype))
    b3p = jnp.zeros((1, Ap), f32).at[:, :num_actions].set(params["b3"].astype(f32))

    # Zero-pad activations (rows to Bp, features to 128 multiples).
    sp = jnp.zeros((Bp, Sp), f32).at[:B, :num_inputs].set(state.astype(f32))
    ap = jnp.zeros((Bp, Ap), f32).at[:B, :num_actions].set(action.astype(f32))

    grid = (pl.cdiv(Bp, TB),)

    def row_spec(cols):
        return pl.BlockSpec((TB, cols), lambda i: (i, 0))

    def resident_spec(arr):
        return pl.BlockSpec(arr.shape, lambda i: (0, 0))

    out_padded = pl.pallas_call(
        _bcq_kernel,
        out_shape=jax.ShapeDtypeStruct((Bp, Ap), out_dtype),
        grid=grid,
        in_specs=[
            row_spec(Sp),            # state tile
            row_spec(Ap),            # action tile
            resident_spec(w1s),
            resident_spec(w1a),
            resident_spec(b1p),
            resident_spec(w2p),
            resident_spec(b2p),
            resident_spec(w3p),
            resident_spec(b3p),
        ],
        out_specs=row_spec(Ap),
        compiler_params=pltpu.CompilerParams(
            dimension_semantics=("parallel",)),
    )(sp, ap, w1s, w1a, b1p, w2p, b2p, w3p, b3p)

    return out_padded[:B, :num_actions]


def init_params(key, num_inputs, num_actions, hidden_size, init_w=0.3,
                dtype=jnp.float32):
    """Mimic torch.nn.Linear default init (U[-1/sqrt(fan_in), 1/sqrt(fan_in)]),
    with linear3 overridden to U[-init_w, init_w], as in the module."""
    keys = jax.random.split(key, 6)
    fan1 = num_inputs + num_actions
    fan2 = hidden_size

    def uni(k, shape, bound):
        return jax.random.uniform(k, shape, dtype, minval=-bound, maxval=bound)

    b1v = 1.0 / (fan1 ** 0.5)
    b2v = 1.0 / (fan2 ** 0.5)
    return {
        # stored [in, out] (transposed w.r.t. torch.nn.Linear)
        "w1": uni(keys[0], (fan1, hidden_size), b1v),
        "b1": uni(keys[1], (1, hidden_size), b1v),
        "w2": uni(keys[2], (hidden_size, hidden_size), b2v),
        "b2": uni(keys[3], (1, hidden_size), b2v),
        "w3": uni(keys[4], (hidden_size, num_actions), init_w),
        "b3": uni(keys[5], (1, num_actions), init_w),
    }


if __name__ == "__main__":
    key = jax.random.PRNGKey(0)
    k_state, k_action, k_params = jax.random.split(key, 3)

    B = 8
    num_inputs = 16
    num_actions = 8
    hidden_size = 32

    state = jax.random.normal(k_state, (B, num_inputs), dtype=jnp.float32)
    action = jax.random.normal(k_action, (B, num_actions), dtype=jnp.float32)
    params = init_params(k_params, num_inputs, num_actions, hidden_size)

    # Pure-JAX f32 reference (eval-mode dropout == identity).
    x = jnp.concatenate([state, action], axis=1)
    h = jnp.maximum(x @ params["w1"] + params["b1"], 0.0)
    h = jnp.maximum(h @ params["w2"] + params["b2"], 0.0)
    ref = h @ params["w3"] + params["b3"] + action

    # Exact-precision path (f32 matmuls on the MXU).
    out_f32 = bcq_perturbator_forward(state, action, params,
                                      compute_dtype=jnp.float32)
    jax.block_until_ready(out_f32)
    assert out_f32.shape == (B, num_actions)
    assert jnp.allclose(out_f32, ref, atol=1e-4, rtol=1e-4)

    # Default fast path: bf16 matmuls, f32 accumulation / epilogue.
    out = bcq_perturbator_forward(state, action, params)
    jax.block_until_ready(out)
    assert out.shape == (B, num_actions)
    assert jnp.allclose(out, ref, atol=5e-2, rtol=5e-2)

    print("KERNEL_OK")
</pallas_src>

<mosaic_0001>
module attributes {stable_mosaic.version = 11 : i64} {
  func.func @_bcq_kernel(%arg0: i32, %arg1: memref<8x128xf32, #tpu.memory_space<vmem>>, %arg2: memref<8x128xf32, #tpu.memory_space<vmem>>, %arg3: memref<128x128xf32, #tpu.memory_space<vmem>>, %arg4: memref<128x128xf32, #tpu.memory_space<vmem>>, %arg5: memref<1x128xf32, #tpu.memory_space<vmem>>, %arg6: memref<128x128xf32, #tpu.memory_space<vmem>>, %arg7: memref<1x128xf32, #tpu.memory_space<vmem>>, %arg8: memref<128x128xf32, #tpu.memory_space<vmem>>, %arg9: memref<1x128xf32, #tpu.memory_space<vmem>>, %arg10: memref<8x128xf32, #tpu.memory_space<vmem>>) attributes {dimension_semantics = [#tpu.dimension_semantics<parallel>], iteration_bounds = array<i64: 1>, scalar_prefetch = 0 : i64, scratch_operands = 0 : i64, tpu.core_type = #tpu.core_type<tc>, window_params = [{transform_indices = @transform_0, window_bounds = array<i64: 8, 128>}, {transform_indices = @transform_1, window_bounds = array<i64: 8, 128>}, {pipeline_mode = #tpu.pipeline_mode<synchronous>, transform_indices = @transform_2, window_bounds = array<i64: 128, 128>}, {pipeline_mode = #tpu.pipeline_mode<synchronous>, transform_indices = @transform_3, window_bounds = array<i64: 128, 128>}, {pipeline_mode = #tpu.pipeline_mode<synchronous>, transform_indices = @transform_4, window_bounds = array<i64: 1, 128>}, {pipeline_mode = #tpu.pipeline_mode<synchronous>, transform_indices = @transform_5, window_bounds = array<i64: 128, 128>}, {pipeline_mode = #tpu.pipeline_mode<synchronous>, transform_indices = @transform_6, window_bounds = array<i64: 1, 128>}, {pipeline_mode = #tpu.pipeline_mode<synchronous>, transform_indices = @transform_7, window_bounds = array<i64: 128, 128>}, {pipeline_mode = #tpu.pipeline_mode<synchronous>, transform_indices = @transform_8, window_bounds = array<i64: 1, 128>}, {transform_indices = @transform_9, window_bounds = array<i64: 8, 128>}]} {
    %c0 = arith.constant 0 : index
    %c0_0 = arith.constant 0 : index
    %0 = vector.load %arg1[%c0, %c0_0] : memref<8x128xf32, #tpu.memory_space<vmem>>, vector<8x128xf32>
    %c0_1 = arith.constant 0 : index
    %c0_2 = arith.constant 0 : index
    %1 = vector.load %arg2[%c0_1, %c0_2] : memref<8x128xf32, #tpu.memory_space<vmem>>, vector<8x128xf32>
    %c0_3 = arith.constant 0 : index
    %c0_4 = arith.constant 0 : index
    %2 = vector.load %arg3[%c0_3, %c0_4] : memref<128x128xf32, #tpu.memory_space<vmem>>, vector<128x128xf32>
    %cst = arith.constant dense<0.000000e+00> : vector<8x128xf32>
    %3 = tpu.matmul %0, %2, %cst {dimension_numbers = #tpu.dot_dimension_numbers<[1], [0], [0], [1], [0, 0, 1, 1], [], []>} : vector<8x128xf32>, vector<128x128xf32>, vector<8x128xf32> -> vector<8x128xf32>
    %c0_5 = arith.constant 0 : index
    %c0_6 = arith.constant 0 : index
    %4 = vector.load %arg4[%c0_5, %c0_6] : memref<128x128xf32, #tpu.memory_space<vmem>>, vector<128x128xf32>
    %cst_7 = arith.constant dense<0.000000e+00> : vector<8x128xf32>
    %5 = tpu.matmul %1, %4, %cst_7 {dimension_numbers = #tpu.dot_dimension_numbers<[1], [0], [0], [1], [0, 0, 1, 1], [], []>} : vector<8x128xf32>, vector<128x128xf32>, vector<8x128xf32> -> vector<8x128xf32>
    %6 = arith.addf %3, %5 : vector<8x128xf32>
    %c0_8 = arith.constant 0 : index
    %c0_9 = arith.constant 0 : index
    %7 = vector.load %arg5[%c0_8, %c0_9] : memref<1x128xf32, #tpu.memory_space<vmem>>, vector<1x128xf32>
    %8 = vector.broadcast %7 : vector<1x128xf32> to vector<8x128xf32>
    %9 = arith.addf %6, %8 : vector<8x128xf32>
    %cst_10 = arith.constant 0.000000e+00 : f32
    %10 = vector.broadcast %cst_10 : f32 to vector<8x128xf32>
    %11 = arith.maximumf %9, %10 : vector<8x128xf32>
    %c0_11 = arith.constant 0 : index
    %c0_12 = arith.constant 0 : index
    %12 = vector.load %arg6[%c0_11, %c0_12] : memref<128x128xf32, #tpu.memory_space<vmem>>, vector<128x128xf32>
    %cst_13 = arith.constant dense<0.000000e+00> : vector<8x128xf32>
    %13 = tpu.matmul %11, %12, %cst_13 {dimension_numbers = #tpu.dot_dimension_numbers<[1], [0], [0], [1], [0, 0, 1, 1], [], []>} : vector<8x128xf32>, vector<128x128xf32>, vector<8x128xf32> -> vector<8x128xf32>
    %c0_14 = arith.constant 0 : index
    %c0_15 = arith.constant 0 : index
    %14 = vector.load %arg7[%c0_14, %c0_15] : memref<1x128xf32, #tpu.memory_space<vmem>>, vector<1x128xf32>
    %15 = vector.broadcast %14 : vector<1x128xf32> to vector<8x128xf32>
    %16 = arith.addf %13, %15 : vector<8x128xf32>
    %cst_16 = arith.constant 0.000000e+00 : f32
    %17 = vector.broadcast %cst_16 : f32 to vector<8x128xf32>
    %18 = arith.maximumf %16, %17 : vector<8x128xf32>
    %c0_17 = arith.constant 0 : index
    %c0_18 = arith.constant 0 : index
    %19 = vector.load %arg8[%c0_17, %c0_18] : memref<128x128xf32, #tpu.memory_space<vmem>>, vector<128x128xf32>
    %cst_19 = arith.constant dense<0.000000e+00> : vector<8x128xf32>
    %20 = tpu.matmul %18, %19, %cst_19 {dimension_numbers = #tpu.dot_dimension_numbers<[1], [0], [0], [1], [0, 0, 1, 1], [], []>} : vector<8x128xf32>, vector<128x128xf32>, vector<8x128xf32> -> vector<8x128xf32>
    %c0_20 = arith.constant 0 : index
    %c0_21 = arith.constant 0 : index
    %21 = vector.load %arg9[%c0_20, %c0_21] : memref<1x128xf32, #tpu.memory_space<vmem>>, vector<1x128xf32>
    %22 = vector.broadcast %21 : vector<1x128xf32> to vector<8x128xf32>
    %23 = arith.addf %20, %22 : vector<8x128xf32>
    %24 = arith.addf %23, %1 : vector<8x128xf32>
    %c0_22 = arith.constant 0 : index
    %c0_23 = arith.constant 0 : index
    %25 = vector.load %arg10[%c0_22, %c0_23] : memref<8x128xf32, #tpu.memory_space<vmem>>, vector<8x128xf32>
    tpu.vector_store %arg10[%c0_22, %c0_23], %24 {strides = array<i32>} : memref<8x128xf32, #tpu.memory_space<vmem>>, vector<8x128xf32>,
    return
  }
  func.func @transform_0(%arg0: i32) -> (i32, i32) {
    %c0_i32 = arith.constant 0 : i32
    %c0_i32_0 = arith.constant 0 : i32
    return %arg0, %c0_i32 : i32, i32
  }
  func.func @transform_1(%arg0: i32) -> (i32, i32) {
    %c0_i32 = arith.constant 0 : i32
    %c0_i32_0 = arith.constant 0 : i32
    return %arg0, %c0_i32 : i32, i32
  }
  func.func @transform_2(%arg0: i32) -> (i32, i32) {
    %c0_i32 = arith.constant 0 : i32
    %c0_i32_0 = arith.constant 0 : i32
    %c0_i32_1 = arith.constant 0 : i32
    return %c0_i32, %c0_i32_0 : i32, i32
  }
  func.func @transform_3(%arg0: i32) -> (i32, i32) {
    %c0_i32 = arith.constant 0 : i32
    %c0_i32_0 = arith.constant 0 : i32
    %c0_i32_1 = arith.constant 0 : i32
    return %c0_i32, %c0_i32_0 : i32, i32
  }
  func.func @transform_4(%arg0: i32) -> (i32, i32) {
    %c0_i32 = arith.constant 0 : i32
    %c0_i32_0 = arith.constant 0 : i32
    %c0_i32_1 = arith.constant 0 : i32
    return %c0_i32, %c0_i32_0 : i32, i32
  }
  func.func @transform_5(%arg0: i32) -> (i32, i32) {
    %c0_i32 = arith.constant 0 : i32
    %c0_i32_0 = arith.constant 0 : i32
    %c0_i32_1 = arith.constant 0 : i32
    return %c0_i32, %c0_i32_0 : i32, i32
  }
  func.func @transform_6(%arg0: i32) -> (i32, i32) {
    %c0_i32 = arith.constant 0 : i32
    %c0_i32_0 = arith.constant 0 : i32
    %c0_i32_1 = arith.constant 0 : i32
    return %c0_i32, %c0_i32_0 : i32, i32
  }
  func.func @transform_7(%arg0: i32) -> (i32, i32) {
    %c0_i32 = arith.constant 0 : i32
    %c0_i32_0 = arith.constant 0 : i32
    %c0_i32_1 = arith.constant 0 : i32
    return %c0_i32, %c0_i32_0 : i32, i32
  }
  func.func @transform_8(%arg0: i32) -> (i32, i32) {
    %c0_i32 = arith.constant 0 : i32
    %c0_i32_0 = arith.constant 0 : i32
    %c0_i32_1 = arith.constant 0 : i32
    return %c0_i32, %c0_i32_0 : i32, i32
  }
  func.func @transform_9(%arg0: i32) -> (i32, i32) {
    %c0_i32 = arith.constant 0 : i32
    %c0_i32_0 = arith.constant 0 : i32
    return %arg0, %c0_i32 : i32, i32
  }
}

</mosaic_0001>

<bundles_post_ra>
// kernel: tpu_custom_call.1
= control target key start
LH: loop header
LB: loop body
LE: loop exit
PB: predicated region body
PF: predicated region fallthrough
CT: control target
= control target key end

     0   :  { %14 = vsyncpa [#allocation3], 0  ;;  %s1195_s0 = inlined_call_operand.hbm [shape: f32[8,128], index: 0, kind: input, shape index: {}]   ;;  %s1196_s1 = inlined_call_operand.hbm [shape: f32[8,128], index: 1, kind: input, shape index: {}]   ;;  %s1197_s2 = inlined_call_operand.hbm [shape: f32[128,128], index: 2, kind: input, shape index: {}]   ;;  %s1198_s3 = inlined_call_operand.hbm [shape: f32[128,128], index: 3, kind: input, shape index: {}]   ;;  %s1199_s4 = inlined_call_operand.vmem [shape: f32[1,128], index: 4, kind: input, shape index: {}]   ;;  %s1200_s5 = inlined_call_operand.hbm [shape: f32[128,128], index: 5, kind: input, shape index: {}]   ;;  %s1201_s6 = inlined_call_operand.vmem [shape: f32[1,128], index: 6, kind: input, shape index: {}]   ;;  %s1202_s7 = inlined_call_operand.hbm [shape: f32[128,128], index: 7, kind: input, shape index: {}]   ;;  %s1203_s8 = inlined_call_operand.vmem [shape: f32[1,128], index: 8, kind: input, shape index: {}]   ;;  %s1204_s9 = inlined_call_operand.hbm [shape: f32[8,128], index: 9, kind: output, shape index: {}]  }
   0x1   :  { %15 = vsyncpa [#allocation6], 0 }
   0x2   :  { %16 = vsyncpa [#allocation9], 0 }
   0x3   :  { %17 = vsyncpa [#allocation12], 0 }
   0x4   :  { %18 = vsyncpa [#allocation4], 0  ;;  %s984_s30 = smov [#allocation5]   ;;  %s820_s13 = scalar_lea.hbm %s1196_s1, 128 }
   0x5   :  { %s35_s10 = sshll.u32 %s984_s30, 4  ;;  %p821_p0 = scmp.ne.s32.totalorder %s1196_s1, %s820_s13  ;;  %s36_s10 = int_to_ptr.vmem [resolvable:$true] %s35_s10 }
   0x6   :  { %p824_p1 = scmp.lt.u32.totalorder %s820_s13, %s1196_s1 }
   0x8   :  { %p826_p2 = pnand %p824_p1, %p821_p0 }
   0xa   :  { %829 = shalt.err (!%p826_p2)
}
   0xb   :  { %s830_s18 = scalar_lea.vmem %s36_s10, 128  ;;  %p835_p4 = scmp.lt.s32.totalorder %s36_s10, %s36_s10 }
   0xc   :  { %p831_p3 = scmp.ne.s32.totalorder %s36_s10, %s830_s18  ;;  %p836_p5 = scmp.lt.s32.totalorder %s830_s18, %s830_s18 }
   0xe   :  { %p837_p6 = por %p836_p5, %p835_p4 }
  0x10   :  { %p838_p7 = pnand %p837_p6, %p831_p3 }
  0x12   :  { %841 = shalt.err (!%p838_p7)
}
  0x13   :  { %38 = dma.hbm_to_vmem [thread:$0]  %s1196_s1, 128, %s36_s10, [#allocation6]  }
  0x14   :  { %s985_s21 = smov [#allocation8]   ;;  %s986_s23 = smov [#allocation2]  }
  0x15   :  { %s56_s22 = sshll.u32 %s985_s21, 4  ;;  %s25_s24 = sshll.u32 %s986_s23, 4  ;;  %s57_s22 = int_to_ptr.vmem [resolvable:$true] %s56_s22  ;;  %s26_s24 = int_to_ptr.vmem [resolvable:$true] %s25_s24 }
  0x16   :  { %s842_s27 = scalar_lea.hbm %s1198_s3, 2048 }
  0x17   :  { %p843_p8 = scmp.ne.s32.totalorder %s1198_s3, %s842_s27  ;;  %p846_p9 = scmp.lt.u32.totalorder %s842_s27, %s1198_s3 }
  0x19   :  { %p848_p10 = pnand %p846_p9, %p843_p8 }
  0x1b   :  { %851 = shalt.err (!%p848_p10)
}
  0x1c   :  { %s852_s1 = scalar_lea.vmem %s57_s22, 2048  ;;  %p857_p12 = scmp.lt.s32.totalorder %s57_s22, %s57_s22 }
  0x1d   :  { %p853_p11 = scmp.ne.s32.totalorder %s57_s22, %s852_s1  ;;  %p858_p13 = scmp.lt.s32.totalorder %s852_s1, %s852_s1 }
  0x1f   :  { %p859_p0 = por %p858_p13, %p857_p12 }
  0x21   :  { %p860_p1 = pnand %p859_p0, %p853_p11 }
  0x23   :  { %863 = shalt.err (!%p860_p1)
}
  0x24   :  { %s987_s10 = smov 128   ;;  %s988_s12 = smov 8  }
  0x25   :  { %62 = dma.hbm_to_vmem [thread:$0]  %s1198_s3, 2048, %s57_s22, [#allocation9], %s987_s10, %s987_s10, %s988_s12  }
  0x26   :  { %s864_s17 = scalar_lea.hbm %s1195_s0, 128 }
  0x27   :  { %p865_p2 = scmp.ne.s32.totalorder %s1195_s0, %s864_s17  ;;  %p868_p3 = scmp.lt.u32.totalorder %s864_s17, %s1195_s0 }
  0x29   :  { %p870_p4 = pnand %p868_p3, %p865_p2 }
  0x2b   :  { %873 = shalt.err (!%p870_p4)
}
  0x2c   :  { %s874_s23 = scalar_lea.vmem %s26_s24, 128  ;;  %p879_p6 = scmp.lt.s32.totalorder %s26_s24, %s26_s24 }
  0x2d   :  { %p875_p5 = scmp.ne.s32.totalorder %s26_s24, %s874_s23  ;;  %p880_p7 = scmp.lt.s32.totalorder %s874_s23, %s874_s23 }
  0x2f   :  { %p881_p8 = por %p880_p7, %p879_p6 }
  0x31   :  { %p882_p9 = pnand %p881_p8, %p875_p5 }
  0x33   :  { %885 = shalt.err (!%p882_p9)
}
  0x34   :  { %28 = dma.hbm_to_vmem [thread:$0]  %s1195_s0, 128, %s26_s24, [#allocation3]  }
  0x35   :  { %s989_s25 = smov [#allocation7]   ;;  %s990_s27 = smov [#allocation10]  }
  0x36   :  { %s44_s26 = sshll.u32 %s989_s25, 4  ;;  %s70_s28 = sshll.u32 %s990_s27, 4  ;;  %s45_s26 = int_to_ptr.vmem [resolvable:$true] %s44_s26  ;;  %s71_s28 = int_to_ptr.vmem [resolvable:$true] %s70_s28 }
  0x37   :  { %s886_s11 = scalar_lea.hbm %s1197_s2, 2048 }
  0x38   :  { %p887_p10 = scmp.ne.s32.totalorder %s1197_s2, %s886_s11  ;;  %p890_p11 = scmp.lt.u32.totalorder %s886_s11, %s1197_s2 }
  0x3a   :  { %p892_p12 = pnand %p890_p11, %p887_p10 }
  0x3c   :  { %895 = shalt.err (!%p892_p12)
}
  0x3d   :  { %s896_s0 = scalar_lea.vmem %s45_s26, 2048  ;;  %p901_p0 = scmp.lt.s32.totalorder %s45_s26, %s45_s26 }
  0x3e   :  { %p897_p13 = scmp.ne.s32.totalorder %s45_s26, %s896_s0  ;;  %p902_p1 = scmp.lt.s32.totalorder %s896_s0, %s896_s0 }
  0x40   :  { %p903_p2 = por %p902_p1, %p901_p0 }
  0x42   :  { %p904_p3 = pnand %p903_p2, %p897_p13 }
  0x44   :  { %907 = shalt.err (!%p904_p3)
}
  0x45   :  { %50 = dma.hbm_to_vmem [thread:$0]  %s1197_s2, 2048, %s45_s26, [#allocation6], %s987_s10, %s987_s10, %s988_s12  }
  0x46   :  { %s908_s19 = scalar_lea.hbm %s1200_s5, 2048 }
  0x47   :  { %p909_p4 = scmp.ne.s32.totalorder %s1200_s5, %s908_s19  ;;  %p912_p5 = scmp.lt.u32.totalorder %s908_s19, %s1200_s5 }
  0x49   :  { %p914_p6 = pnand %p912_p5, %p909_p4 }
  0x4b   :  { %917 = shalt.err (!%p914_p6)
}
  0x4c   :  { %s918_s22 = scalar_lea.vmem %s71_s28, 2048  ;;  %p923_p8 = scmp.lt.s32.totalorder %s71_s28, %s71_s28 }
  0x4d   :  { %p919_p7 = scmp.ne.s32.totalorder %s71_s28, %s918_s22  ;;  %p924_p9 = scmp.lt.s32.totalorder %s918_s22, %s918_s22 }
  0x4f   :  { %p925_p10 = por %p924_p9, %p923_p8 }
  0x51   :  { %p926_p11 = pnand %p925_p10, %p919_p7 }
  0x53   :  { %929 = shalt.err (!%p926_p11)
}
  0x54   :  { %76 = dma.hbm_to_vmem [thread:$0]  %s1200_s5, 2048, %s71_s28, [#allocation9], %s987_s10, %s987_s10, %s988_s12  }
  0x55   :  { %s991_s26 = smov [#allocation11]   ;;  %s930_s11 = scalar_lea.hbm %s1202_s7, 2048 }
  0x56   :  { %s84_s27 = sshll.u32 %s991_s26, 4  ;;  %p931_p12 = scmp.ne.s32.totalorder %s1202_s7, %s930_s11  ;;  %s85_s27 = int_to_ptr.vmem [resolvable:$true] %s84_s27 }
  0x57   :  { %p934_p13 = scmp.lt.u32.totalorder %s930_s11, %s1202_s7 }
  0x59   :  { %p936_p0 = pnand %p934_p13, %p931_p12 }
  0x5b   :  { %939 = shalt.err (!%p936_p0)
}
  0x5c   :  { %s940_s0 = scalar_lea.vmem %s85_s27, 2048  ;;  %p945_p2 = scmp.lt.s32.totalorder %s85_s27, %s85_s27 }
  0x5d   :  { %p941_p1 = scmp.ne.s32.totalorder %s85_s27, %s940_s0  ;;  %p946_p3 = scmp.lt.s32.totalorder %s940_s0, %s940_s0 }
  0x5f   :  { %p947_p4 = por %p946_p3, %p945_p2 }
  0x61   :  { %p948_p5 = pnand %p947_p4, %p941_p1 }
  0x63   :  { %951 = shalt.err (!%p948_p5)
}
  0x64   :  { %90 = dma.hbm_to_vmem [thread:$0]  %s1202_s7, 2048, %s85_s27, [#allocation12], %s987_s10, %s987_s10, %s988_s12  }
  0x65   :  { %974 = dma.done.wait [#allocation3], 128  }
  0x66   :  { %975 = vsyncadd [#allocation3], 4294967168 }
  0x67   :  { %976 = dma.done.wait [#allocation6], 2176  }
  0x68   :  { %977 = vsyncadd [#allocation6], 4294965120 }
  0x69   :  { %978 = dma.done.wait [#allocation9], 4096  }
  0x6a   :  { %979 = vsyncadd [#allocation9], 4294963200 }
  0x6b   :  { %980 = dma.done.wait [#allocation12], 2048  }
  0x6c   :  { %981 = vsyncadd [#allocation12], 4294965248  ;;  %v992_v0 = vmov 0.0|0.0   ;;  %vm993_vm0 = vmmov 0   ;;  %v994_v1 = vmov 0.0   ;;  %v129_v2 = vld [vmem:[#allocation8] sm:$0xff] }
  0x6d   :  { %712 = vmatprep.subr.bf16.mxu0 %v992_v0  ;;  %736 = vmatprep.subr.bf16.mxu1 %v992_v0  ;;  %v130_v3 = vld [vmem:[#allocation8 + $0x8] sm:$0xff]  ;;  %v113_v4 = vld [vmem:[#allocation7] sm:$0xff]  ;;  %v131_v7 = vld [vmem:[#allocation8 + $0x10] sm:$0xff]  ;;  %s995_s17 = smov [#allocation13]  }
  0x6e   :  { %604 = vmatprep.mubr.msk.f32.mxu0 %vm993_vm0, %v994_v1  ;;  %639 = vmatprep.mubr.msk.f32.mxu1 %vm993_vm0, %v994_v1  ;;  %v713_v5 = vpack.c.bf16 %v130_v3, %v129_v2  ;;  %v114_v6 = vld [vmem:[#allocation7 + $0x8] sm:$0xff]  ;;  %v132_v8 = vld [vmem:[#allocation8 + $0x18] sm:$0xff]  ;;  %v115_v10 = vld [vmem:[#allocation7 + $0x10] sm:$0xff]  ;;  %s489_s18 = sshll.u32 %s995_s17, 4  ;;  %s490_s18 = int_to_ptr.vmem [resolvable:$true] %s489_s18 }
  0x6f   :  { %v737_v9 = vpack.c.bf16 %v114_v6, %v113_v4  ;;  %v116_v11 = vld [vmem:[#allocation7 + $0x18] sm:$0xff]  ;;  %v716_v12 = vpack.c.bf16 %v132_v8, %v131_v7  ;;  %v133_v14 = vld [vmem:[#allocation8 + $0x20] sm:$0xff]  ;;  %v134_v15 = vld [vmem:[#allocation8 + $0x28] sm:$0xff]  ;;  %s952_s19 = scalar_lea.vmem %s490_s18, 128  ;;  %p957_p7 = scmp.lt.s32.totalorder %s490_s18, %s490_s18 }
  0x70   :  { %714 = vmatpush3.bf16.msra.mxu0 %v713_v5  ;;  %v740_v13 = vpack.c.bf16 %v116_v11, %v115_v10  ;;  %v117_v16 = vld [vmem:[#allocation7 + $0x20] sm:$0xff]  ;;  %v118_v17 = vld [vmem:[#allocation7 + $0x28] sm:$0xff]  ;;  %v719_v18 = vpack.c.bf16 %v134_v15, %v133_v14  ;;  %v135_v20 = vld [vmem:[#allocation8 + $0x30] sm:$0xff]  ;;  %p953_p6 = scmp.ne.s32.totalorder %s490_s18, %s952_s19  ;;  %p958_p8 = scmp.lt.s32.totalorder %s952_s19, %s952_s19 }
  0x71   :  { %738 = vmatpush3.bf16.msra.mxu1 %v737_v9  ;;  %715 = vmatprep.subr.bf16.mxu0 %v992_v0  ;;  %v743_v19 = vpack.c.bf16 %v118_v17, %v117_v16  ;;  %v136_v21 = vld [vmem:[#allocation8 + $0x38] sm:$0xff]  ;;  %v119_v22 = vld [vmem:[#allocation7 + $0x30] sm:$0xff]  ;;  %v137_v26 = vld [vmem:[#allocation8 + $0x40] sm:$0xff] }
  0x72   :  { %739 = vmatprep.subr.bf16.mxu1 %v992_v0  ;;  %v120_v23 = vld [vmem:[#allocation7 + $0x38] sm:$0xff]  ;;  %v722_v24 = vpack.c.bf16 %v136_v21, %v135_v20  ;;  %v138_v27 = vld [vmem:[#allocation8 + $0x48] sm:$0xff]  ;;  %v121_v28 = vld [vmem:[#allocation7 + $0x40] sm:$0xff]  ;;  %p959_p9 = por %p958_p8, %p957_p7 }
  0x73   :  { %v746_v25 = vpack.c.bf16 %v120_v23, %v119_v22  ;;  %v122_v29 = vld [vmem:[#allocation7 + $0x48] sm:$0xff]  ;;  %v725_v30 = vpack.c.bf16 %v138_v27, %v137_v26  ;;  %v139_v32 = vld [vmem:[#allocation8 + $0x50] sm:$0xff]  ;;  %v140_v33 = vld [vmem:[#allocation8 + $0x58] sm:$0xff] }
  0x74   :  { %717 = vmatpush3.bf16.msra.mxu0 %v716_v12  ;;  %v749_v31 = vpack.c.bf16 %v122_v29, %v121_v28  ;;  %v123_v34 = vld [vmem:[#allocation7 + $0x50] sm:$0xff]  ;;  %v124_v35 = vld [vmem:[#allocation7 + $0x58] sm:$0xff]  ;;  %v728_v36 = vpack.c.bf16 %v140_v33, %v139_v32  ;;  %v141_v38 = vld [vmem:[#allocation8 + $0x60] sm:$0xff]  ;;  %p960_p10 = pnand %p959_p9, %p953_p6 }
  0x75   :  { %741 = vmatpush3.bf16.msra.mxu1 %v740_v13  ;;  %718 = vmatprep.subr.bf16.mxu0 %v992_v0  ;;  %v752_v37 = vpack.c.bf16 %v124_v35, %v123_v34  ;;  %v142_v39 = vld [vmem:[#allocation8 + $0x68] sm:$0xff]  ;;  %v125_v40 = vld [vmem:[#allocation7 + $0x60] sm:$0xff]  ;;  %v143_v44 = vld [vmem:[#allocation8 + $0x70] sm:$0xff] }
  0x76   :  { %742 = vmatprep.subr.bf16.mxu1 %v992_v0  ;;  %v126_v41 = vld [vmem:[#allocation7 + $0x68] sm:$0xff]  ;;  %v731_v42 = vpack.c.bf16 %v142_v39, %v141_v38  ;;  %v144_v45 = vld [vmem:[#allocation8 + $0x78] sm:$0xff]  ;;  %v127_v46 = vld [vmem:[#allocation7 + $0x70] sm:$0xff] }
  0x77   :  { %v755_v43 = vpack.c.bf16 %v126_v41, %v125_v40  ;;  %v128_v47 = vld [vmem:[#allocation7 + $0x78] sm:$0xff]  ;;  %v734_v48 = vpack.c.bf16 %v144_v45, %v143_v44  ;;  %v294_v50 = vld [vmem:[#allocation10] sm:$0xff]  ;;  %v295_v51 = vld [vmem:[#allocation10 + $0x8] sm:$0xff] }
  0x78   :  { %720 = vmatpush3.bf16.msra.mxu0 %v719_v18  ;;  %v758_v49 = vpack.c.bf16 %v128_v47, %v127_v46  ;;  %v1150_v52 = vld [vmem:[#allocation5] sm:$0xff]  ;;  %v761_v53 = vpack.c.bf16 %v295_v51, %v294_v50  ;;  %v111_v54 = vld [vmem:[#allocation2] sm:$0xff]  ;;  %v298_v58 = vld [vmem:[#allocation10 + $0x20] sm:$0xff] }
  0x79   :  { %744 = vmatpush3.bf16.msra.mxu1 %v743_v19  ;;  %721 = vmatprep.subr.bf16.mxu0 %v992_v0  ;;  %v296_v55 = vld [vmem:[#allocation10 + $0x10] sm:$0xff]  ;;  %v297_v56 = vld [vmem:[#allocation10 + $0x18] sm:$0xff]  ;;  %v299_v59 = vld [vmem:[#allocation10 + $0x28] sm:$0xff] }
  0x7a   :  { %745 = vmatprep.subr.bf16.mxu1 %v992_v0  ;;  %v764_v57 = vpack.c.bf16 %v297_v56, %v296_v55  ;;  %v767_v60 = vpack.c.bf16 %v299_v59, %v298_v58  ;;  %v300_v61 = vld [vmem:[#allocation10 + $0x30] sm:$0xff]  ;;  %v301_v62 = vld [vmem:[#allocation10 + $0x38] sm:$0xff]  ;;  %v302_v2 = vld [vmem:[#allocation10 + $0x40] sm:$0xff] }
  0x7b   :  { %v770_v63 = vpack.c.bf16 %v301_v62, %v300_v61  ;;  %v303_v3 = vld [vmem:[#allocation10 + $0x48] sm:$0xff]  ;;  %v304_v5 = vld [vmem:[#allocation10 + $0x50] sm:$0xff]  ;;  %v305_v6 = vld [vmem:[#allocation10 + $0x58] sm:$0xff] }
  0x7c   :  { %723 = vmatpush3.bf16.msra.mxu0 %v722_v24  ;;  %v773_v4 = vpack.c.bf16 %v303_v3, %v302_v2  ;;  %v306_v7 = vld [vmem:[#allocation10 + $0x60] sm:$0xff]  ;;  %v307_v8 = vld [vmem:[#allocation10 + $0x68] sm:$0xff]  ;;  %v308_v10 = vld [vmem:[#allocation10 + $0x70] sm:$0xff] }
  0x7d   :  { %747 = vmatpush3.bf16.msra.mxu1 %v746_v25  ;;  %724 = vmatprep.subr.bf16.mxu0 %v992_v0  ;;  %v779_v9 = vpack.c.bf16 %v307_v8, %v306_v7  ;;  %v309_v11 = vld [vmem:[#allocation10 + $0x78] sm:$0xff]  ;;  %v388_v13 = vld [vmem:[#allocation11] sm:$0xff]  ;;  %v389_v14 = vld [vmem:[#allocation11 + $0x8] sm:$0xff] }
  0x7e   :  { %748 = vmatprep.subr.bf16.mxu1 %v992_v0  ;;  %v782_v12 = vpack.c.bf16 %v309_v11, %v308_v10  ;;  %v390_v15 = vld [vmem:[#allocation11 + $0x10] sm:$0xff]  ;;  %v785_v16 = vpack.c.bf16 %v389_v14, %v388_v13  ;;  %v391_v17 = vld [vmem:[#allocation11 + $0x18] sm:$0xff]  ;;  %v392_v19 = vld [vmem:[#allocation11 + $0x20] sm:$0xff] }
  0x7f   :  { %v788_v18 = vpack.c.bf16 %v391_v17, %v390_v15  ;;  %v393_v20 = vld [vmem:[#allocation11 + $0x28] sm:$0xff]  ;;  %v394_v22 = vld [vmem:[#allocation11 + $0x30] sm:$0xff]  ;;  %v395_v23 = vld [vmem:[#allocation11 + $0x38] sm:$0xff] }
  0x80   :  { %726 = vmatpush3.bf16.msra.mxu0 %v725_v30  ;;  %v791_v21 = vpack.c.bf16 %v393_v20, %v392_v19  ;;  %v794_v24 = vpack.c.bf16 %v395_v23, %v394_v22  ;;  %v396_v25 = vld [vmem:[#allocation11 + $0x40] sm:$0xff]  ;;  %v397_v26 = vld [vmem:[#allocation11 + $0x48] sm:$0xff]  ;;  %v398_v28 = vld [vmem:[#allocation11 + $0x50] sm:$0xff] }
  0x81   :  { %750 = vmatpush3.bf16.msra.mxu1 %v749_v31  ;;  %727 = vmatprep.subr.bf16.mxu0 %v992_v0  ;;  %v797_v27 = vpack.c.bf16 %v397_v26, %v396_v25  ;;  %v399_v29 = vld [vmem:[#allocation11 + $0x58] sm:$0xff]  ;;  %v400_v31 = vld [vmem:[#allocation11 + $0x60] sm:$0xff]  ;;  %v401_v32 = vld [vmem:[#allocation11 + $0x68] sm:$0xff] }
  0x82   :  { %751 = vmatprep.subr.bf16.mxu1 %v992_v0  ;;  %v800_v30 = vpack.c.bf16 %v399_v29, %v398_v28  ;;  %v803_v33 = vpack.c.bf16 %v401_v32, %v400_v31 }
  0x84   :  { %729 = vmatpush3.bf16.msra.mxu0 %v728_v36  ;;  %v501_v36 = vld [vmem:[%s1199_s4] ss:$0 sm:$0xff] }
  0x85   :  { %753 = vmatpush3.bf16.msra.mxu1 %v752_v37  ;;  %730 = vmatprep.subr.bf16.mxu0 %v992_v0 }
  0x86   :  { %754 = vmatprep.subr.bf16.mxu1 %v992_v0 }
  0x88   :  { %732 = vmatpush3.bf16.msra.mxu0 %v731_v42  ;;  %v402_v42 = vld [vmem:[#allocation11 + $0x70] sm:$0xff] }
  0x89   :  { %756 = vmatpush3.bf16.msra.mxu1 %v755_v43  ;;  %733 = vmatprep.subr.bf16.mxu0 %v992_v0  ;;  %v403_v43 = vld [vmem:[#allocation11 + $0x78] sm:$0xff] }
  0x8a   :  { %757 = vmatprep.subr.bf16.mxu1 %v992_v0  ;;  %v806_v44 = vpack.c.bf16 %v403_v43, %v402_v42 }
  0x8c   :  { %735 = vmatpush3.bf16.msra.mxu0 %v734_v48 }
  0x8d   :  { %759 = vmatpush3.bf16.msra.mxu1 %v758_v49  ;;  %760 = vmatprep.subr.bf16.mxu0 %v992_v0  ;;  %v503_v49 = vld [vmem:[%s1203_s8] ss:$0 sm:$0xff] }
  0x8e   :  { %784 = vmatprep.subr.bf16.mxu1 %v992_v0 }
  0x8f   :  { %605 = vmatmul.mubr.f32.vlgmr.msra.gmra.mrb[0].mxu0 %v1150_v52 }
  0x90   :  { %640 = vmatmul.mubr.f32.vlgmr.msra.gmra.mrb[0].mxu1 %v111_v54  ;;  %762 = vmatpush3.bf16.msra.mxu0 %v761_v53 }
  0x91   :  { %763 = vmatprep.subr.bf16.mxu0 %v992_v0  ;;  %674 = vmatprep.mubr.msk.f32.mxu0 %vm993_vm0, %v994_v1 }
  0x92   :  { %709 = vmatprep.mubr.msk.f32.mxu1 %vm993_vm0, %v994_v1  ;;  %v776_v1 = vpack.c.bf16 %v305_v6, %v304_v5  ;;  %786 = vmatpush3.bf16.msra.mxu1 %v785_v16 }
  0x93   :  { %787 = vmatprep.subr.bf16.mxu1 %v992_v0 }
  0x94   :  { %765 = vmatpush3.bf16.msra.mxu0 %v764_v57 }
  0x95   :  { %766 = vmatprep.subr.bf16.mxu0 %v992_v0 }
  0x96   :  { %789 = vmatpush3.bf16.msra.mxu1 %v788_v18 }
  0x97   :  { %790 = vmatprep.subr.bf16.mxu1 %v992_v0 }
  0x98   :  { %768 = vmatpush3.bf16.msra.mxu0 %v767_v60 }
  0x99   :  { %769 = vmatprep.subr.bf16.mxu0 %v992_v0 }
  0x9a   :  { %792 = vmatpush3.bf16.msra.mxu1 %v791_v21 }
  0x9b   :  { %793 = vmatprep.subr.bf16.mxu1 %v992_v0 }
  0x9c   :  { %771 = vmatpush3.bf16.msra.mxu0 %v770_v63 }
  0x9d   :  { %772 = vmatprep.subr.bf16.mxu0 %v992_v0 }
  0x9e   :  { %795 = vmatpush3.bf16.msra.mxu1 %v794_v24 }
  0x9f   :  { %796 = vmatprep.subr.bf16.mxu1 %v992_v0 }
  0xa0   :  { %774 = vmatpush3.bf16.msra.mxu0 %v773_v4 }
  0xa1   :  { %775 = vmatprep.subr.bf16.mxu0 %v992_v0 }
  0xa2   :  { %798 = vmatpush3.bf16.msra.mxu1 %v797_v27 }
  0xa3   :  { %799 = vmatprep.subr.bf16.mxu1 %v992_v0 }
  0xa4   :  { %777 = vmatpush3.bf16.msra.mxu0 %v776_v1 }
  0xa5   :  { %778 = vmatprep.subr.bf16.mxu0 %v992_v0 }
  0xa6   :  { %801 = vmatpush3.bf16.msra.mxu1 %v800_v30 }
  0xa7   :  { %802 = vmatprep.subr.bf16.mxu1 %v992_v0 }
  0xa8   :  { %780 = vmatpush3.bf16.msra.mxu0 %v779_v9 }
  0xa9   :  { %781 = vmatprep.subr.bf16.mxu0 %v992_v0 }
  0xaa   :  { %804 = vmatpush3.bf16.msra.mxu1 %v803_v33 }
  0xab   :  { %805 = vmatprep.subr.bf16.mxu1 %v992_v0  ;;  %v502_v0 = vld [vmem:[%s1201_s6] ss:$0 sm:$0xff] }
  0xac   :  { %783 = vmatpush3.bf16.msra.mxu0 %v782_v12 }
  0xae   :  { %807 = vmatpush3.bf16.msra.mxu1 %v806_v44 }
 0x162   :  { %v211_v34 = vpop.f32.mrb[0].mxu0 }
 0x163   :  { %v281_v35 = vpop.f32.mrb[0].mxu1  ;;  %v606_v37 = vpop.f32.mrb[1].mxu0 }
 0x164   :  { %v282_v38 = vadd.f32 %v281_v35, %v211_v34  ;;  %v641_v39 = vpop.f32.mrb[1].mxu1 }
 0x166   :  { %v292_v40 = vadd.f32 %v501_v36, %v282_v38 }
 0x168   :  { %v293_v41 = vmax.f32 %v292_v40, 0.0 }
 0x16a   :  { %675 = vmatmul.mubr.f32.vlgmr.msra.gmra.mrb[2].mxu0 %v293_v41 }
 0x23d   :  { %v383_v45 = vpop.f32.mrb[2].mxu0 }
 0x23e   :  { %v384_v46 = vadd.f32 %v502_v0, %v383_v45  ;;  %v676_v47 = vpop.f32.mrb[3].mxu0 }
 0x240   :  { %v387_v48 = vmax.f32 %v384_v46, 0.0 }
 0x242   :  { %710 = vmatmul.mubr.f32.vlgmr.msra.gmra.mrb[2].mxu1 %v387_v48 }
 0x315   :  { %v477_v50 = vpop.f32.mrb[2].mxu1 }
 0x316   :  { %v478_v51 = vadd.f32 %v503_v49, %v477_v50  ;;  %v711_v53 = vpop.f32.mrb[3].mxu1 }
 0x318   :  { %v481_v54 = vadd.f32 %v478_v51, %v1150_v52 }
 0x31a   :  { %482 = vst [vmem:[#allocation13] sm:$0xff] %v481_v54 }
 0x31b   :  { %963 = shalt.err (!%p960_p10)
}
 0x31c   :  { %s964_s8 = scalar_lea.hbm %s1204_s9, 128 }
 0x31d   :  { %p965_p11 = scmp.ne.s32.totalorder %s1204_s9, %s964_s8  ;;  %p968_p12 = scmp.lt.u32.totalorder %s964_s8, %s1204_s9 }
 0x31f   :  { %p970_p13 = pnand %p968_p12, %p965_p11 }
 0x321   :  { %973 = shalt.err (!%p970_p13)
}
 0x322   :  { %492 = dma.vmem_to_hbm [thread:$0]  %s490_s18, 128, %s1204_s9, [#allocation4]  }
 0x323   :  { %982 = dma.done.wait [#allocation4], 128  }
 0x324   :  { %983 = vsyncadd [#allocation4], 4294967168 }
 0x325   :  { %496 = vsyncpa [#allocation3], 1 }
 0x326   :  { %497 = vsyncpa [#allocation6], 1 }
 0x327   :  { %498 = vsyncpa [#allocation9], 1 }
 0x328   :  { %499 = vsyncpa [#allocation12], 1 }
 0x329   :  { %500 = vsyncpa [#allocation4], 1 }

</bundles_post_ra>
